<compile_context>
chip_gen: v5e
topology: v5e:2x2
jax: 0.10.0
libtpu: 0.0.40
codegen_flags: <defaults>
</compile_context>

<pallas_src>
import jax
import jax.numpy as jnp
from jax.experimental import pallas as pl
from jax.experimental.pallas import tpu as pltpu


def eca_kernel(x_ref, w_ref, o_ref):
    """x_ref: (1, TC, L) tile; w_ref: (TC, 1) center-tap weights; o_ref like x_ref."""
    x = x_ref[...]
    xf = x.astype(jnp.float32)                        # f32 internal math (bf16-safe)
    # AdaptiveAvgPool1d(1): mean over the length axis, accumulated in f32.
    y = jnp.mean(xf, axis=-1, keepdims=True)          # (1, TC, 1)
    # Depthwise Conv1d on a length-1 zero-padded input == per-channel scale.
    w = w_ref[...].astype(jnp.float32)[None, :, :]    # (1, TC, 1)
    scale = jax.nn.sigmoid(y * w)                     # (1, TC, 1)
    o_ref[...] = (xf * scale).astype(o_ref.dtype)     # broadcast over L


def _choose_channel_tile(C, L, itemsize, block_budget_bytes):
    """Largest channel tile (multiple of 8, or full C) whose block fits the budget."""
    if C * L * itemsize <= block_budget_bytes:
        return int(C)
    tc = (block_budget_bytes // (L * itemsize)) // 8 * 8
    tc = max(tc, 8)          # floor: single-pass design needs >= 8 sublanes per block
    return int(min(tc, C))


def eca_forward(x, conv_weight, *,
                block_budget_bytes=2 * 1024 * 1024,
                vmem_limit_bytes=32 * 1024 * 1024):
    """ECA forward. x: (N, C, L); conv_weight: (C, 1, k) as in PyTorch Conv1d(groups=C)."""
    N, C, L = x.shape
    assert conv_weight.shape[0] == C and conv_weight.shape[1] == 1
    k = conv_weight.shape[-1]
    # The center-tap collapse is only valid for odd k (PyTorch pad=(k-1)//2).
    assert k % 2 == 1, "ECA depthwise conv requires an odd kernel size"

    # Hoist center-tap extraction out of the kernel: only w[:, 0, (k-1)//2]
    # ever multiplies real (non-padding) data on the length-1 pooled input.
    w_center = conv_weight[:, 0, (k - 1) // 2][:, None]       # (C, 1)

    tc = _choose_channel_tile(C, L, jnp.dtype(x.dtype).itemsize, block_budget_bytes)
    grid = (N, pl.cdiv(C, tc))

    return pl.pallas_call(
        eca_kernel,
        out_shape=jax.ShapeDtypeStruct((N, C, L), x.dtype),
        grid=grid,
        in_specs=[
            pl.BlockSpec((1, tc, L), lambda n, c: (n, c, 0)),
            pl.BlockSpec((tc, 1), lambda n, c: (c, 0)),
        ],
        out_specs=pl.BlockSpec((1, tc, L), lambda n, c: (n, c, 0)),
        compiler_params=pltpu.CompilerParams(
            dimension_semantics=("parallel", "parallel"),
            vmem_limit_bytes=vmem_limit_bytes,
        ),
    )(x, w_center)


def eca_reference(x, conv_weight):
    """Pure-JAX reference that runs the actual depthwise Conv1d (spec-faithful)."""
    C = x.shape[1]
    k = conv_weight.shape[-1]
    xf = x.astype(jnp.float32)
    y = jnp.mean(xf, axis=-1, keepdims=True)                  # (N, C, 1)
    conv = jax.lax.conv_general_dilated(
        y, conv_weight.astype(jnp.float32),
        window_strides=(1,),
        padding=[((k - 1) // 2, (k - 1) // 2)],
        dimension_numbers=("NCH", "OIH", "NCH"),
        feature_group_count=C)
    scale = jax.nn.sigmoid(conv)                              # (N, C, 1)
    return (xf * scale).astype(x.dtype)


if __name__ == "__main__":
    key = jax.random.PRNGKey(0)
    kx1, kw1, kx2, kw2, kx3 = jax.random.split(key, 5)

    # Case 1: small module-default shape (k=3), f32, single channel block.
    N, C, L, K = 2, 8, 16, 3
    x1 = jax.random.normal(kx1, (N, C, L), dtype=jnp.float32)
    w1 = jax.random.normal(kw1, (C, 1, K), dtype=jnp.float32) * 0.5
    out1 = jax.block_until_ready(eca_forward(x1, w1))
    ref1 = eca_reference(x1, w1)
    assert jnp.allclose(out1, ref1, atol=1e-5, rtol=1e-5), "case1 mismatch vs reference"

    # Case 2: force the channel-tiling path (TC=16 < C=64) with a tiny budget.
    N2, C2, L2 = 2, 64, 128
    x2 = jax.random.normal(kx2, (N2, C2, L2), dtype=jnp.float32)
    w2 = jax.random.normal(kw2, (C2, 1, K), dtype=jnp.float32) * 0.5
    out2 = jax.block_until_ready(
        eca_forward(x2, w2, block_budget_bytes=16 * L2 * 4))
    ref2 = eca_reference(x2, w2)
    assert jnp.allclose(out2, ref2, atol=1e-5, rtol=1e-5), "case2 mismatch vs reference"

    # Case 3: bf16 I/O with f32 internal math.
    x3 = jax.random.normal(kx3, (N2, C2, L2), dtype=jnp.bfloat16)
    out3 = jax.block_until_ready(eca_forward(x3, w2))
    ref3 = eca_reference(x3, w2)
    assert jnp.allclose(out3.astype(jnp.float32), ref3.astype(jnp.float32),
                        atol=2e-2, rtol=2e-2), "case3 mismatch vs reference"

    print("KERNEL_OK")
</pallas_src>

<mosaic_0001>
module attributes {stable_mosaic.version = 11 : i64} {
  func.func @eca_kernel(%arg0: i32, %arg1: i32, %arg2: memref<1x8x16xf32, #tpu.memory_space<vmem>>, %arg3: memref<8x1xf32, #tpu.memory_space<vmem>>, %arg4: memref<1x8x16xf32, #tpu.memory_space<vmem>>) attributes {dimension_semantics = [#tpu.dimension_semantics<parallel>, #tpu.dimension_semantics<parallel>], iteration_bounds = array<i64: 2, 1>, scalar_prefetch = 0 : i64, scratch_operands = 0 : i64, tpu.core_type = #tpu.core_type<tc>, window_params = [{transform_indices = @transform_0, window_bounds = array<i64: 1, 8, 16>}, {transform_indices = @transform_1, window_bounds = array<i64: 8, 1>}, {transform_indices = @transform_2, window_bounds = array<i64: 1, 8, 16>}]} {
    %c0 = arith.constant 0 : index
    %c0_0 = arith.constant 0 : index
    %c0_1 = arith.constant 0 : index
    %0 = vector.load %arg2[%c0, %c0_0, %c0_1] : memref<1x8x16xf32, #tpu.memory_space<vmem>>, vector<1x8x16xf32>
    %cst = arith.constant dense<0.000000e+00> : vector<1x8xf32>
    %1 = vector.multi_reduction <add>, %0, %cst [2] : vector<1x8x16xf32> to vector<1x8xf32>
    %2 = vector.shape_cast %1 : vector<1x8xf32> to vector<1x8x1xf32>
    %cst_2 = arith.constant 1.600000e+01 : f32
    %3 = vector.broadcast %cst_2 : f32 to vector<1x8x1xf32>
    %4 = arith.divf %2, %3 : vector<1x8x1xf32>
    %c0_3 = arith.constant 0 : index
    %c0_4 = arith.constant 0 : index
    %5 = vector.load %arg3[%c0_3, %c0_4] : memref<8x1xf32, #tpu.memory_space<vmem>>, vector<8x1xf32>
    %6 = vector.shape_cast %5 : vector<8x1xf32> to vector<1x8x1xf32>
    %7 = arith.mulf %4, %6 : vector<1x8x1xf32>
    %8 = arith.negf %7 : vector<1x8x1xf32>
    %9 = math.exp %8 : vector<1x8x1xf32>
    %cst_5 = arith.constant 1.000000e+00 : f32
    %10 = vector.broadcast %cst_5 : f32 to vector<1x8x1xf32>
    %11 = arith.addf %10, %9 : vector<1x8x1xf32>
    %12 = arith.divf %10, %11 : vector<1x8x1xf32>
    %13 = vector.broadcast %12 : vector<1x8x1xf32> to vector<1x8x16xf32>
    %14 = arith.mulf %0, %13 : vector<1x8x16xf32>
    %c0_6 = arith.constant 0 : index
    %c0_7 = arith.constant 0 : index
    %c0_8 = arith.constant 0 : index
    %15 = vector.load %arg4[%c0_6, %c0_7, %c0_8] : memref<1x8x16xf32, #tpu.memory_space<vmem>>, vector<1x8x16xf32>
    tpu.vector_store %arg4[%c0_6, %c0_7, %c0_8], %14 {strides = array<i32>} : memref<1x8x16xf32, #tpu.memory_space<vmem>>, vector<1x8x16xf32>,
    return
  }
  func.func @transform_0(%arg0: i32, %arg1: i32) -> (i32, i32, i32) {
    %c0_i32 = arith.constant 0 : i32
    %c0_i32_0 = arith.constant 0 : i32
    return %arg0, %arg1, %c0_i32 : i32, i32, i32
  }
  func.func @transform_1(%arg0: i32, %arg1: i32) -> (i32, i32) {
    %c0_i32 = arith.constant 0 : i32
    %c0_i32_0 = arith.constant 0 : i32
    return %arg1, %c0_i32 : i32, i32
  }
  func.func @transform_2(%arg0: i32, %arg1: i32) -> (i32, i32, i32) {
    %c0_i32 = arith.constant 0 : i32
    %c0_i32_0 = arith.constant 0 : i32
    return %arg0, %arg1, %c0_i32 : i32, i32, i32
  }
}

</mosaic_0001>

<bundles_post_ra>
// kernel: tpu_custom_call.1
= control target key start
LH: loop header
LB: loop body
LE: loop exit
PB: predicated region body
PF: predicated region fallthrough
CT: control target
= control target key end

     0   :  { %7 = vsyncpa [#allocation3], 0  ;;  %s694_s0 = inlined_call_operand.hbm [shape: f32[2,8,16], index: 0, kind: input, shape index: {}]   ;;  %s695_s1 = inlined_call_operand.vmem [shape: f32[8,1], index: 1, kind: input, shape index: {}]   ;;  %s696_s2 = inlined_call_operand.hbm [shape: f32[2,8,16], index: 2, kind: output, shape index: {}]  }
   0x1   :  { %9 = vsyncpa [#allocation3 + $0x1], 0 }
   0x2   :  { %10 = vsyncpa [#allocation4], 0 }
   0x3   :  { %12 = vsyncpa [#allocation4 + $0x1], 0  ;;  %s565_s9 = smov 0   ;;  %s567_s10 = smov 0  }
   0x4   :  { %s569_s11 = smov 0   ;;  %s571_s12 = smov 0  }
   0x5   :  { %s573_s13 = smov 0   ;;  %s575_s14 = smov 0  }
   0x6 LB: > { %s348_s15 = sadd.s32 4294967295, %s546_s14   ;;  %s349_s16 = sadd.s32 4294967294, %s546_s14   ;;  %s546_s14 = sphi %s575_s14, %s18_s14   ;;  %s542_s13 = sphi %s573_s13, %s705_s13   ;;  %s538_s12 = sphi %s571_s12, %s704_s12   ;;  %s534_s11 = sphi %s569_s11, %s703_s11   ;;  %s530_s10 = sphi %s567_s10, %s702_s10   ;;  %s526_s9 = sphi %s565_s9, %s701_s9  }
   0x7   : > { %s30_s17 = sadd.s32 1, %s542_s13  ;;  %s39_s18 = sadd.s32 1, %s534_s11 }
   0x8   : > { %p32_p0 = scmp.ge.s32.totalorder %s30_s17, 2  ;;  %p46_p1 = scmp.ne.s32.totalorder %s534_s11, %s530_s10 }
   0x9   : > { %p47_p2 = scmp.eq.s32.totalorder %s546_s14, 0  ;;  %p52_p3 = scmp.ne.s32.totalorder %s530_s10, %s526_s9 }
   0xa   : > { %s707_s17 = smov (%p32_p0, %s30_s17), 0  ;;  %p53_p5 = scmp.eq.s32.totalorder %s348_s15, 0 }
   0xb   : > { %p606_p4 = por %p47_p2, %p46_p1  ;;  %s34_s20 = ssub.s32 %s542_s13, %s707_s17 }
   0xc   : > { %p104_p6 = scmp.eq.s32.totalorder %s348_s15, 1  ;;  %p37_p7 = scmp.eq.s32.totalorder %s34_s20, 0 }
   0xd   : > { %p612_p8 = por %p53_p5, %p52_p3  ;;  %p110_p10 = scmp.eq.s32.totalorder %s349_s16, 1 }
   0xe   : > { %p616_p9 = por %p104_p6, %p46_p1  ;;  %p352_p12 = scmp.ge.s32.totalorder %s546_s14, 2 }
   0xf   : > { %s621_s23 = scalar_select %p37_p7, %s534_s11, %s39_s18  }
  0x10   : > { %p623_p11 = por %p110_p10, %p52_p3  ;;  %p375_p13 = scmp.lt.s32.totalorder %s546_s14, 2 }
  0x11   : > { %s137_s25 = sand.u32 1, %s534_s11   ;;  %s354_s27 = sshll.u32 %s542_s13, 3 }
  0x12   : > { %s353_s26 = sshll.u32 %s137_s25, 3  ;;  %s146_s30 = scalar_lea.hbm %s694_s0, %s354_s27 }
  0x13   : > { %s141_s3 = scalar_lea.vmem [#allocation2], %s353_s26  ;;  %s148_s5 = sshll.u32 %s146_s30, 4  ;;  %s149_s5 = int_to_ptr.hbm [resolvable:$true] %s148_s5 }
  0x14   : > { %s150_s4 = sshll.u32 %s141_s3, 4  ;;  %p368_p0 = pnand %p375_p13, %p606_p4  ;;  %s151_s4 = int_to_ptr.vmem [resolvable:$true] %s150_s4 }
  0x15   : > { %p355_p1 = scmp.ge.s32.totalorder %s546_s14, 1  ;;  %p155_p2 = scmp.lt.s32.totalorder %s546_s14, 3 }
  0x16   : > { %s138_s6 = scalar_lea.sflag [#allocation3], %s137_s25 }
  0x17   : > { %370 = dma.hbm_to_vmem [thread:$0]  (!%p368_p0), %s149_s5, 128, %s151_s4, %s138_s6  }
  0x18   : > { %p156_p3 = pnand %p355_p1, %p155_p2 }
  0x19   : > { %s639_s7 = sand.u32 (!%p156_p3), 1, %s530_s10  }
  0x1a   : > { %159 = sbr.rel (%p156_p3) target bundleno = 302 (0x12e), region = 28  ;;  %s356_s8 = sshll.u32 (!%p156_p3), %s639_s7, 3 }
  0x1b   : > { %s162_s15 = scalar_lea.sflag (!%p156_p3), [#allocation3], %s639_s7  ;;  %s165_s16 = scalar_lea.vmem (!%p156_p3), [#allocation2], %s356_s8 }
  0x1f   : > { %517 = dma.done.wait (%p612_p8), %s162_s15, 128  }
  0x20   : > { %519 = vsyncadd (%p612_p8), %s162_s15, 4294967168  ;;  %vm196_vm0 = vcmask 130048   ;;  %v195_v0 = vld [vmem:[%s165_s16] sm:$0xff]  ;;  %v548_v2 = vmov 16.0   ;;  %v549_v5 = vmov 0   ;;  %s360_s20 = sshll.u32 %s538_s12, 3 }
  0x21   : > { %v197_v1 = vsel %vm196_vm0, %v195_v0, 0.0  ;;  %428 = vrcp.f32 %v548_v2  ;;  %427 = vset.pattern.permute.xlu0 %v549_v5  ;;  %v208_v10 = vld [vmem:[%s695_s1] sm:$0xff]  ;;  %s248_s26 = scalar_lea.hbm %s696_s2, %s360_s20  ;;  %s190_s27 = scalar_lea.vmem [#allocation5], %s356_s8 }
  0x22   : > { %198 = vadd.xlane.f32.xlu0 %v197_v1  ;;  %s250_s28 = sshll.u32 %s190_s27, 4  ;;  %s252_s29 = sshll.u32 %s248_s26, 4  ;;  %s251_s28 = int_to_ptr.vmem [resolvable:$true] %s250_s28  ;;  %s253_s29 = int_to_ptr.hbm [resolvable:$true] %s252_s29 }
  0x23   : > { %s237_s30 = scalar_lea.sflag [#allocation4], %s639_s7  ;;  %s478_s3 = sshra.s32 %s253_s29, 4  ;;  %s479_s3 = int_to_ptr.hbm [resolvable:$true] %s478_s3 }
  0x24   : > { %s480_s4 = scalar_lea.hbm %s479_s3, 8  ;;  %s484_s6 = scalar_lea.hbm %s696_s2, 16 }
  0x25   : > { %p481_p4 = scmp.ne.s32.totalorder %s479_s3, %s480_s4  ;;  %p485_p7 = scmp.lt.s32.totalorder %s479_s3, %s696_s2 }
  0x26   : > { %p486_p8 = scmp.lt.s32.totalorder %s484_s6, %s480_s4 }
  0x27   : > { %v429_v3 = vpop.eup %428  ;;  %p482_p5 = pnand %p481_p4, %p616_p9 }
  0x28   : > { %v201_v4 = vmul.f32 16.0, %v429_v3  ;;  %vm205_vm1 = vweird.f32 %v429_v3  ;;  %p487_p10 = por %p486_p8, %p485_p7 }
  0x29   : > { %p483_p6 = pneg %p482_p5 }
  0x2a   : > { %v202_v6 = vsub.f32 1.0, %v201_v4 }
  0x2b   : > { %p488_p13 = pnand %p487_p10, %p483_p6 }
  0x2c   : > { %v203_v7 = vmul.f32 %v429_v3, %v202_v6 }
  0x2e   : > { %v204_v8 = vadd.f32 %v429_v3, %v203_v7 }
  0x30   : > { %v206_v9 = vsel %vm205_vm1, %v429_v3, %v204_v8 }
  0x95   : > { %v199_v11 = vpop.xlane.xlu0 %198 }
  0x96   : > { %v207_v12 = vmul.f32 %v206_v9, %v199_v11 }
  0x98   : > { %v209_v13 = vmul.f32 %v208_v10, %v207_v12 }
  0x9a   : > { %v358_v14 = vmul.f32 -1.442695, %v209_v13 }
  0x9c   : > { %430 = vpow2.f32 %v358_v14 }
  0xa2   : > { %v431_v15 = vpop.eup %430 }
  0xa3   : > { %v213_v16 = vadd.f32 1.0, %v431_v15 }
  0xa5   : > { %432 = vrcp.f32 %v213_v16  ;;  %v225_v20 = vand.u32 2147483648, %v213_v16  ;;  %v223_v22 = vand.u32 2147483647, %v213_v16  ;;  %vm219_vm3 = vweird.f32 %v213_v16 }
  0xa7   : > { %v226_v24 = vor.u32 1.1754944e-38, %v225_v20  ;;  %vm224_vm5 = vcmp.eq.f32.partialorder %v223_v22, 8.507059e+37 }
  0xab   : > { %v433_v17 = vpop.eup %432 }
  0xac   : > { %v215_v18 = vmul.f32 %v433_v17, %v213_v16  ;;  %vm220_vm2 = vweird.f32 %v433_v17 }
  0xad   : > { %vm221_vm4 = vmor %vm219_vm3, %vm220_vm2 }
  0xae   : > { %v216_v19 = vsub.f32 1.0, %v215_v18 }
  0xb0   : > { %v217_v21 = vmul.f32 %v433_v17, %v216_v19 }
  0xb2   : > { %v218_v23 = vadd.f32 %v433_v17, %v217_v21 }
  0xb4   : > { %v222_v25 = vsel %vm221_vm4, %v433_v17, %v218_v23 }
  0xb5   : > { %v227_v26 = vsel %vm224_vm5, %v226_v24, %v222_v25 }
  0xb6   : > { %231 = vperm.xlu0 %427, %v227_v26  }
 0x128   : > { %v232_v27 = vpop.permute.xlu0 %231 }
 0x129   : > { %v234_v28 = vmul.f32 %v232_v27, %v195_v0 }
 0x12b   : > { %235 = vst.msk [vmem:[%s190_s27] sm:$0xff] %vm196_vm0, %v234_v28 }
 0x12c   : > { %491 = shalt.err (!%p488_p13)
}
 0x12d   : > { %365 = dma.vmem_to_hbm [thread:$0]  (%p616_p9), %s251_s28, 128, %s253_s29, %s237_s30  }
 0x12e PF: > { %s264_s7 = sand.u32 1, %s526_s9   ;;  %p372_p0 = pnand %p352_p12, %p623_p11 }
 0x12f   : > { %s265_s16 = scalar_lea.sflag [#allocation4], %s264_s7 }
 0x130   : > { %p373_p1 = pneg %p372_p0 }
 0x132   : > { %521 = dma.done.wait (%p373_p1), %s265_s16, 128  }
 0x133   : > { %523 = vsyncadd (%p373_p1), %s265_s16, 4294967168  ;;  %s18_s14 = sadd.s32 1, %s546_s14   ;;  %s701_s9 = smov %s530_s10 }
 0x134   : > { %p15_p2 = scmp.ge.s32.totalorder %s18_s14, 4   ;;  %s702_s10 = smov %s534_s11 }
 0x135   : > { %s703_s11 = smov %s621_s23  ;;  %s704_s12 = smov %s542_s13 }
 0x136   : > { %s705_s13 = smov %s707_s17  ;;  %17 = sbr.rel (!%p15_p2) target bundleno = 6 (0x6), region = 76 }
 0x13b   :  { %271 = vsyncpa [#allocation3], 1 }
 0x13c   :  { %273 = vsyncpa [#allocation3 + $0x1], 1 }
 0x13d   :  { %274 = vsyncpa [#allocation4], 1 }
 0x13e   :  { %276 = vsyncpa [#allocation4 + $0x1], 1 }

</bundles_post_ra>
